<compile_context>
chip_gen: v6e
topology: v6e:2x2x1
jax: 0.10.0
libtpu: 0.0.40
codegen_flags: <defaults>
</compile_context>

<pallas_src>
import functools

import jax
import jax.numpy as jnp
from jax.experimental import pallas as pl
from jax.experimental.pallas import tpu as pltpu


def _textcnn_kernel(raw_ref, wconv_ref, bconv_ref, bn_scale_ref, bn_shift_ref,
                    wm_ref, bm_ref, wfc_ref, bfc_ref,
                    feat_ref, avg_ref, avgbn_ref, xm_ref, xfinal_ref,
                    *, TB, Lp, L):
    # Conv1d(kernel=word_dim, stride=word_dim) over flattened embeddings == matmul.
    raw = raw_ref[...]                                                # (TB*Lp, D) bf16
    feat = jnp.dot(raw, wconv_ref[...],
                   preferred_element_type=jnp.float32) + bconv_ref[...]
    feat = jnp.maximum(feat, 0.0)                                     # ReLU, f32
    feat_ref[...] = feat

    # avg_pool1d over the token axis -> (TB, F)
    Fdim = feat.shape[-1]
    feat3 = feat.reshape(TB, Lp, Fdim)
    if Lp != L:  # mask zero-padded tail tokens (they carry relu(b_conv))
        tok = jax.lax.broadcasted_iota(jnp.int32, (TB, Lp, Fdim), 1)
        feat3 = jnp.where(tok < L, feat3, 0.0)
    x_avg = jnp.sum(feat3, axis=1) * (1.0 / L)
    avg_ref[...] = x_avg

    # BatchNorm1d (eval mode; running stats pre-folded into scale/shift).
    avgbn_ref[...] = x_avg * bn_scale_ref[...] + bn_shift_ref[...]

    # dropout (eval mode) == identity.  BN is folded into wm/bm outside, so
    # fc_m consumes x_avg directly (keeps the matmul path free of VPU work).
    x_m = jnp.dot(x_avg.astype(wm_ref.dtype), wm_ref[...],
                  preferred_element_type=jnp.float32) + bm_ref[...]
    xm_ref[...] = x_m

    x_final = jnp.dot(x_m.astype(wfc_ref.dtype), wfc_ref[...],
                      preferred_element_type=jnp.float32) + bfc_ref[...]
    xfinal_ref[...] = x_final


def textcnn_nlt_dan_forward(word_idx, params, *, max_len, word_dim, filter_num,
                            num_classes, bn_eps=1e-5, batch_tile=8):
    """Returns (x_final, x_m, x_avg_bn, x_avg, x_feat_permuted, raw_feature)."""
    B = word_idx.shape[0]
    L, D, F, C = max_len, word_dim, filter_num, num_classes
    Lp = -(-L // 8) * 8                      # sublane-aligned token count
    Cp = -(-C // 128) * 128                  # lane-dense final-logits width

    # Batch tile: a multiple of 8 that divides B (or the whole batch).
    if B % 8 == 0:
        TB = max(8, (min(batch_tile, B) // 8) * 8)
        while B % TB:
            TB -= 8
    else:
        TB = B
    n_tiles = B // TB

    # Embedding gather (glue; data-dependent indexing stays in plain JAX).
    # TODO(synk): the gather could be fused via scalar-prefetch + pl.Element,
    # but raw_feature must be materialized in HBM anyway (module output), so
    # only the re-read would be saved.
    raw_feature = params["emb"][word_idx].astype(jnp.float32)        # (B, L, D)
    raw_pad = raw_feature
    if Lp != L:
        raw_pad = jnp.pad(raw_feature, ((0, 0), (0, Lp - L), (0, 0)))
    raw2 = raw_pad.reshape(B * Lp, D).astype(jnp.bfloat16)           # (B*Lp, D)

    # Fold BN running stats (eval) into scale/shift, and fold those into fc_m.
    bn_scale = params["bn_gamma"] / jnp.sqrt(params["bn_var"] + bn_eps)   # (F,)
    bn_shift = params["bn_beta"] - params["bn_mean"] * bn_scale           # (F,)
    w_m_fold = (bn_scale[:, None] * params["w_m"]).astype(jnp.bfloat16)   # (F, D)
    b_m_fold = (bn_shift @ params["w_m"] + params["b_m"]).reshape(1, D)   # (1, D)

    # Pad the classifier to 128 lanes so the final store is unmasked.
    w_fc_pad = jnp.zeros((D, Cp), jnp.bfloat16).at[:, :C].set(
        params["w_fc"].astype(jnp.bfloat16))
    b_fc_pad = jnp.zeros((1, Cp), jnp.float32).at[0, :C].set(params["b_fc"])

    in_arrays = (
        raw2,                                               # (B*Lp, D)  bf16
        params["w_conv"].astype(jnp.bfloat16),              # (D, F)     bf16
        params["b_conv"].reshape(1, F).astype(jnp.float32),
        bn_scale.reshape(1, F).astype(jnp.float32),
        bn_shift.reshape(1, F).astype(jnp.float32),
        w_m_fold,                                           # (F, D)     bf16
        b_m_fold.astype(jnp.float32),                       # (1, D)
        w_fc_pad,                                           # (D, Cp)    bf16
        b_fc_pad,                                           # (1, Cp)
    )

    rows = TB * Lp
    in_specs = [
        pl.BlockSpec((rows, D), lambda b: (b, 0)),   # activation tile: pipelined
        pl.BlockSpec((D, F), lambda b: (0, 0)),      # weights: VMEM-resident
        pl.BlockSpec((1, F), lambda b: (0, 0)),
        pl.BlockSpec((1, F), lambda b: (0, 0)),
        pl.BlockSpec((1, F), lambda b: (0, 0)),
        pl.BlockSpec((F, D), lambda b: (0, 0)),
        pl.BlockSpec((1, D), lambda b: (0, 0)),
        pl.BlockSpec((D, Cp), lambda b: (0, 0)),
        pl.BlockSpec((1, Cp), lambda b: (0, 0)),
    ]

    out_shapes = (
        jax.ShapeDtypeStruct((B * Lp, F), jnp.float32),  # x_feat (flat, L-padded)
        jax.ShapeDtypeStruct((B, F), jnp.float32),       # x_avg
        jax.ShapeDtypeStruct((B, F), jnp.float32),       # x_avg_bn
        jax.ShapeDtypeStruct((B, D), jnp.float32),       # x_m
        jax.ShapeDtypeStruct((B, Cp), jnp.float32),      # x_final (lane-padded)
    )
    out_specs = [
        pl.BlockSpec((rows, F), lambda b: (b, 0)),
        pl.BlockSpec((TB, F), lambda b: (b, 0)),
        pl.BlockSpec((TB, F), lambda b: (b, 0)),
        pl.BlockSpec((TB, D), lambda b: (b, 0)),
        pl.BlockSpec((TB, Cp), lambda b: (b, 0)),
    ]

    feat_flat, x_avg, x_avg_bn, x_m, x_final_pad = pl.pallas_call(
        functools.partial(_textcnn_kernel, TB=TB, Lp=Lp, L=L),
        out_shape=out_shapes,
        grid=(n_tiles,),
        in_specs=in_specs,
        out_specs=out_specs,
        compiler_params=pltpu.CompilerParams(
            dimension_semantics=("parallel",)),   # megacore-shardable on v7x
    )(*in_arrays)

    x_final = x_final_pad[:, :C]
    # PyTorch returns x_feat.permute(0, 2, 1) = (B, L, F); that's exactly the
    # flattened per-token feature map reshaped (and un-padded along L).
    x_feat_permuted = feat_flat.reshape(B, Lp, F)[:, :L, :]

    return x_final, x_m, x_avg_bn, x_avg, x_feat_permuted, raw_feature


def init_params(key, *, vocab_size, word_dim, filter_num, num_classes):
    D, F, C = word_dim, filter_num, num_classes
    ks = jax.random.split(key, 12)
    emb = jax.random.normal(ks[0], (vocab_size + 2, D), jnp.float32) * 0.1
    emb = emb.at[vocab_size + 1].set(0.0)        # padding_idx row is zero
    return {
        "emb": emb,
        # Conv1d weight in PyTorch is (F, 1, D); stored here transposed as (D, F).
        "w_conv": jax.random.normal(ks[1], (D, F), jnp.float32) * (1.0 / jnp.sqrt(D)),
        "b_conv": jax.random.normal(ks[2], (F,), jnp.float32) * 0.01,
        "bn_gamma": 1.0 + 0.1 * jax.random.normal(ks[3], (F,), jnp.float32),
        "bn_beta": 0.1 * jax.random.normal(ks[4], (F,), jnp.float32),
        "bn_mean": 0.05 * jax.random.normal(ks[5], (F,), jnp.float32),
        "bn_var": 1.0 + 0.1 * jnp.abs(jax.random.normal(ks[6], (F,), jnp.float32)),
        # Linear weights stored as (in, out).
        "w_m": jax.random.normal(ks[7], (F, D), jnp.float32) * (1.0 / jnp.sqrt(F)),
        "b_m": jax.random.normal(ks[8], (D,), jnp.float32) * 0.01,
        "w_fc": jax.random.normal(ks[9], (D, C), jnp.float32) * (1.0 / jnp.sqrt(D)),
        "b_fc": jax.random.normal(ks[10], (C,), jnp.float32) * 0.01,
    }


def _reference(word_idx, params, *, max_len, word_dim, filter_num, num_classes,
               bn_eps=1e-5):
    raw = params["emb"][word_idx]                                  # (B, L, D)
    feat = jnp.maximum(jnp.einsum("bld,df->blf", raw, params["w_conv"])
                       + params["b_conv"], 0.0)                    # (B, L, F)
    x_avg = jnp.mean(feat, axis=1)
    x_bn = ((x_avg - params["bn_mean"]) / jnp.sqrt(params["bn_var"] + bn_eps)
            * params["bn_gamma"] + params["bn_beta"])
    x_m = x_bn @ params["w_m"] + params["b_m"]
    x_final = x_m @ params["w_fc"] + params["b_fc"]
    return x_final, x_m, x_bn, x_avg, feat, raw


if __name__ == "__main__":
    # Module-consistent config: in_channel=1, filter_num == word_dim (required
    # for BatchNorm1d(word_dim) applied to (B, filter_num)).  B=16 with an
    # 8-row batch tile exercises the 2-step parallel grid.
    vocab_size, word_dim, filter_num = 50, 128, 128
    max_len, num_classes, batch = 8, 8, 16

    key = jax.random.PRNGKey(0)
    pkey, ikey = jax.random.split(key)
    params = init_params(pkey, vocab_size=vocab_size, word_dim=word_dim,
                         filter_num=filter_num, num_classes=num_classes)
    word_idx = jax.random.randint(ikey, (batch, max_len), 0, vocab_size + 2,
                                  dtype=jnp.int32)

    outs = textcnn_nlt_dan_forward(
        word_idx, params, max_len=max_len, word_dim=word_dim,
        filter_num=filter_num, num_classes=num_classes)
    outs = jax.block_until_ready(outs)

    refs = _reference(word_idx, params, max_len=max_len, word_dim=word_dim,
                      filter_num=filter_num, num_classes=num_classes)
    names = ("x_final", "x_m", "x_avg_bn", "x_avg", "x_feat", "raw_feature")
    for name, o, r in zip(names, outs, refs):
        assert o.shape == r.shape, (name, o.shape, r.shape)
        # bf16 MXU path vs f32 reference -> loose tolerance.
        assert jnp.allclose(o, r, atol=2e-2, rtol=2e-2), name

    print("KERNEL_OK")
</pallas_src>

<mosaic_0001>
module attributes {stable_mosaic.version = 11 : i64} {
  func.func @_textcnn_kernel(%arg0: i32, %arg1: memref<64x128xbf16, #tpu.memory_space<vmem>>, %arg2: memref<128x128xbf16, #tpu.memory_space<vmem>>, %arg3: memref<1x128xf32, #tpu.memory_space<vmem>>, %arg4: memref<1x128xf32, #tpu.memory_space<vmem>>, %arg5: memref<1x128xf32, #tpu.memory_space<vmem>>, %arg6: memref<128x128xbf16, #tpu.memory_space<vmem>>, %arg7: memref<1x128xf32, #tpu.memory_space<vmem>>, %arg8: memref<128x128xbf16, #tpu.memory_space<vmem>>, %arg9: memref<1x128xf32, #tpu.memory_space<vmem>>, %arg10: memref<64x128xf32, #tpu.memory_space<vmem>>, %arg11: memref<8x128xf32, #tpu.memory_space<vmem>>, %arg12: memref<8x128xf32, #tpu.memory_space<vmem>>, %arg13: memref<8x128xf32, #tpu.memory_space<vmem>>, %arg14: memref<8x128xf32, #tpu.memory_space<vmem>>) attributes {dimension_semantics = [#tpu.dimension_semantics<parallel>], iteration_bounds = array<i64: 2>, scalar_prefetch = 0 : i64, scratch_operands = 0 : i64, tpu.core_type = #tpu.core_type<tc>, window_params = [{transform_indices = @transform_0, window_bounds = array<i64: 64, 128>}, {pipeline_mode = #tpu.pipeline_mode<synchronous>, transform_indices = @transform_1, window_bounds = array<i64: 128, 128>}, {pipeline_mode = #tpu.pipeline_mode<synchronous>, transform_indices = @transform_2, window_bounds = array<i64: 1, 128>}, {pipeline_mode = #tpu.pipeline_mode<synchronous>, transform_indices = @transform_3, window_bounds = array<i64: 1, 128>}, {pipeline_mode = #tpu.pipeline_mode<synchronous>, transform_indices = @transform_4, window_bounds = array<i64: 1, 128>}, {pipeline_mode = #tpu.pipeline_mode<synchronous>, transform_indices = @transform_5, window_bounds = array<i64: 128, 128>}, {pipeline_mode = #tpu.pipeline_mode<synchronous>, transform_indices = @transform_6, window_bounds = array<i64: 1, 128>}, {pipeline_mode = #tpu.pipeline_mode<synchronous>, transform_indices = @transform_7, window_bounds = array<i64: 128, 128>}, {pipeline_mode = #tpu.pipeline_mode<synchronous>, transform_indices = @transform_8, window_bounds = array<i64: 1, 128>}, {transform_indices = @transform_9, window_bounds = array<i64: 64, 128>}, {transform_indices = @transform_10, window_bounds = array<i64: 8, 128>}, {transform_indices = @transform_11, window_bounds = array<i64: 8, 128>}, {transform_indices = @transform_12, window_bounds = array<i64: 8, 128>}, {transform_indices = @transform_13, window_bounds = array<i64: 8, 128>}]} {
    %c0 = arith.constant 0 : index
    %c0_0 = arith.constant 0 : index
    %0 = vector.load %arg1[%c0, %c0_0] : memref<64x128xbf16, #tpu.memory_space<vmem>>, vector<64x128xbf16>
    %c0_1 = arith.constant 0 : index
    %c0_2 = arith.constant 0 : index
    %1 = vector.load %arg2[%c0_1, %c0_2] : memref<128x128xbf16, #tpu.memory_space<vmem>>, vector<128x128xbf16>
    %cst = arith.constant dense<0.000000e+00> : vector<64x128xf32>
    %2 = tpu.matmul %0, %1, %cst {dimension_numbers = #tpu.dot_dimension_numbers<[1], [0], [0], [1], [0, 0, 1, 1], [], []>} : vector<64x128xbf16>, vector<128x128xbf16>, vector<64x128xf32> -> vector<64x128xf32>
    %c0_3 = arith.constant 0 : index
    %c0_4 = arith.constant 0 : index
    %3 = vector.load %arg3[%c0_3, %c0_4] : memref<1x128xf32, #tpu.memory_space<vmem>>, vector<1x128xf32>
    %4 = vector.broadcast %3 : vector<1x128xf32> to vector<64x128xf32>
    %5 = arith.addf %2, %4 : vector<64x128xf32>
    %cst_5 = arith.constant 0.000000e+00 : f32
    %6 = vector.broadcast %cst_5 : f32 to vector<64x128xf32>
    %7 = arith.maximumf %5, %6 : vector<64x128xf32>
    %c0_6 = arith.constant 0 : index
    %c0_7 = arith.constant 0 : index
    %8 = vector.load %arg10[%c0_6, %c0_7] : memref<64x128xf32, #tpu.memory_space<vmem>>, vector<64x128xf32>
    tpu.vector_store %arg10[%c0_6, %c0_7], %7 {strides = array<i32>} : memref<64x128xf32, #tpu.memory_space<vmem>>, vector<64x128xf32>,
    %9 = vector.shape_cast %7 : vector<64x128xf32> to vector<8x8x128xf32>
    %cst_8 = arith.constant dense<0.000000e+00> : vector<8x128xf32>
    %10 = vector.multi_reduction <add>, %9, %cst_8 [1] : vector<8x8x128xf32> to vector<8x128xf32>
    %cst_9 = arith.constant 1.250000e-01 : f32
    %11 = vector.broadcast %cst_9 : f32 to vector<8x128xf32>
    %12 = arith.mulf %10, %11 : vector<8x128xf32>
    %c0_10 = arith.constant 0 : index
    %c0_11 = arith.constant 0 : index
    %13 = vector.load %arg11[%c0_10, %c0_11] : memref<8x128xf32, #tpu.memory_space<vmem>>, vector<8x128xf32>
    tpu.vector_store %arg11[%c0_10, %c0_11], %12 {strides = array<i32>} : memref<8x128xf32, #tpu.memory_space<vmem>>, vector<8x128xf32>,
    %c0_12 = arith.constant 0 : index
    %c0_13 = arith.constant 0 : index
    %14 = vector.load %arg4[%c0_12, %c0_13] : memref<1x128xf32, #tpu.memory_space<vmem>>, vector<1x128xf32>
    %15 = vector.broadcast %14 : vector<1x128xf32> to vector<8x128xf32>
    %16 = arith.mulf %12, %15 : vector<8x128xf32>
    %c0_14 = arith.constant 0 : index
    %c0_15 = arith.constant 0 : index
    %17 = vector.load %arg5[%c0_14, %c0_15] : memref<1x128xf32, #tpu.memory_space<vmem>>, vector<1x128xf32>
    %18 = vector.broadcast %17 : vector<1x128xf32> to vector<8x128xf32>
    %19 = arith.addf %16, %18 : vector<8x128xf32>
    %c0_16 = arith.constant 0 : index
    %c0_17 = arith.constant 0 : index
    %20 = vector.load %arg12[%c0_16, %c0_17] : memref<8x128xf32, #tpu.memory_space<vmem>>, vector<8x128xf32>
    tpu.vector_store %arg12[%c0_16, %c0_17], %19 {strides = array<i32>} : memref<8x128xf32, #tpu.memory_space<vmem>>, vector<8x128xf32>,
    %21 = arith.truncf %12 : vector<8x128xf32> to vector<8x128xbf16>
    %c0_18 = arith.constant 0 : index
    %c0_19 = arith.constant 0 : index
    %22 = vector.load %arg6[%c0_18, %c0_19] : memref<128x128xbf16, #tpu.memory_space<vmem>>, vector<128x128xbf16>
    %cst_20 = arith.constant dense<0.000000e+00> : vector<8x128xf32>
    %23 = tpu.matmul %21, %22, %cst_20 {dimension_numbers = #tpu.dot_dimension_numbers<[1], [0], [0], [1], [0, 0, 1, 1], [], []>} : vector<8x128xbf16>, vector<128x128xbf16>, vector<8x128xf32> -> vector<8x128xf32>
    %c0_21 = arith.constant 0 : index
    %c0_22 = arith.constant 0 : index
    %24 = vector.load %arg7[%c0_21, %c0_22] : memref<1x128xf32, #tpu.memory_space<vmem>>, vector<1x128xf32>
    %25 = vector.broadcast %24 : vector<1x128xf32> to vector<8x128xf32>
    %26 = arith.addf %23, %25 : vector<8x128xf32>
    %c0_23 = arith.constant 0 : index
    %c0_24 = arith.constant 0 : index
    %27 = vector.load %arg13[%c0_23, %c0_24] : memref<8x128xf32, #tpu.memory_space<vmem>>, vector<8x128xf32>
    tpu.vector_store %arg13[%c0_23, %c0_24], %26 {strides = array<i32>} : memref<8x128xf32, #tpu.memory_space<vmem>>, vector<8x128xf32>,
    %28 = arith.truncf %26 : vector<8x128xf32> to vector<8x128xbf16>
    %c0_25 = arith.constant 0 : index
    %c0_26 = arith.constant 0 : index
    %29 = vector.load %arg8[%c0_25, %c0_26] : memref<128x128xbf16, #tpu.memory_space<vmem>>, vector<128x128xbf16>
    %cst_27 = arith.constant dense<0.000000e+00> : vector<8x128xf32>
    %30 = tpu.matmul %28, %29, %cst_27 {dimension_numbers = #tpu.dot_dimension_numbers<[1], [0], [0], [1], [0, 0, 1, 1], [], []>} : vector<8x128xbf16>, vector<128x128xbf16>, vector<8x128xf32> -> vector<8x128xf32>
    %c0_28 = arith.constant 0 : index
    %c0_29 = arith.constant 0 : index
    %31 = vector.load %arg9[%c0_28, %c0_29] : memref<1x128xf32, #tpu.memory_space<vmem>>, vector<1x128xf32>
    %32 = vector.broadcast %31 : vector<1x128xf32> to vector<8x128xf32>
    %33 = arith.addf %30, %32 : vector<8x128xf32>
    %c0_30 = arith.constant 0 : index
    %c0_31 = arith.constant 0 : index
    %34 = vector.load %arg14[%c0_30, %c0_31] : memref<8x128xf32, #tpu.memory_space<vmem>>, vector<8x128xf32>
    tpu.vector_store %arg14[%c0_30, %c0_31], %33 {strides = array<i32>} : memref<8x128xf32, #tpu.memory_space<vmem>>, vector<8x128xf32>,
    return
  }
  func.func @transform_0(%arg0: i32) -> (i32, i32) {
    %c0_i32 = arith.constant 0 : i32
    %c0_i32_0 = arith.constant 0 : i32
    return %arg0, %c0_i32 : i32, i32
  }
  func.func @transform_1(%arg0: i32) -> (i32, i32) {
    %c0_i32 = arith.constant 0 : i32
    %c0_i32_0 = arith.constant 0 : i32
    %c0_i32_1 = arith.constant 0 : i32
    return %c0_i32, %c0_i32_0 : i32, i32
  }
  func.func @transform_2(%arg0: i32) -> (i32, i32) {
    %c0_i32 = arith.constant 0 : i32
    %c0_i32_0 = arith.constant 0 : i32
    %c0_i32_1 = arith.constant 0 : i32
    return %c0_i32, %c0_i32_0 : i32, i32
  }
  func.func @transform_3(%arg0: i32) -> (i32, i32) {
    %c0_i32 = arith.constant 0 : i32
    %c0_i32_0 = arith.constant 0 : i32
    %c0_i32_1 = arith.constant 0 : i32
    return %c0_i32, %c0_i32_0 : i32, i32
  }
  func.func @transform_4(%arg0: i32) -> (i32, i32) {
    %c0_i32 = arith.constant 0 : i32
    %c0_i32_0 = arith.constant 0 : i32
    %c0_i32_1 = arith.constant 0 : i32
    return %c0_i32, %c0_i32_0 : i32, i32
  }
  func.func @transform_5(%arg0: i32) -> (i32, i32) {
    %c0_i32 = arith.constant 0 : i32
    %c0_i32_0 = arith.constant 0 : i32
    %c0_i32_1 = arith.constant 0 : i32
    return %c0_i32, %c0_i32_0 : i32, i32
  }
  func.func @transform_6(%arg0: i32) -> (i32, i32) {
    %c0_i32 = arith.constant 0 : i32
    %c0_i32_0 = arith.constant 0 : i32
    %c0_i32_1 = arith.constant 0 : i32
    return %c0_i32, %c0_i32_0 : i32, i32
  }
  func.func @transform_7(%arg0: i32) -> (i32, i32) {
    %c0_i32 = arith.constant 0 : i32
    %c0_i32_0 = arith.constant 0 : i32
    %c0_i32_1 = arith.constant 0 : i32
    return %c0_i32, %c0_i32_0 : i32, i32
  }
  func.func @transform_8(%arg0: i32) -> (i32, i32) {
    %c0_i32 = arith.constant 0 : i32
    %c0_i32_0 = arith.constant 0 : i32
    %c0_i32_1 = arith.constant 0 : i32
    return %c0_i32, %c0_i32_0 : i32, i32
  }
  func.func @transform_9(%arg0: i32) -> (i32, i32) {
    %c0_i32 = arith.constant 0 : i32
    %c0_i32_0 = arith.constant 0 : i32
    return %arg0, %c0_i32 : i32, i32
  }
  func.func @transform_10(%arg0: i32) -> (i32, i32) {
    %c0_i32 = arith.constant 0 : i32
    %c0_i32_0 = arith.constant 0 : i32
    return %arg0, %c0_i32 : i32, i32
  }
  func.func @transform_11(%arg0: i32) -> (i32, i32) {
    %c0_i32 = arith.constant 0 : i32
    %c0_i32_0 = arith.constant 0 : i32
    return %arg0, %c0_i32 : i32, i32
  }
  func.func @transform_12(%arg0: i32) -> (i32, i32) {
    %c0_i32 = arith.constant 0 : i32
    %c0_i32_0 = arith.constant 0 : i32
    return %arg0, %c0_i32 : i32, i32
  }
  func.func @transform_13(%arg0: i32) -> (i32, i32) {
    %c0_i32 = arith.constant 0 : i32
    %c0_i32_0 = arith.constant 0 : i32
    return %arg0, %c0_i32 : i32, i32
  }
}

</mosaic_0001>

<bundles_post_ra>
// kernel: tpu_custom_call.1
= control target key start
LH: loop header
LB: loop body
LE: loop exit
PB: predicated region body
PF: predicated region fallthrough
CT: control target
= control target key end

     0   :  { %s2481_s0 = inlined_call_operand.hbm [shape: bf16[128,128], index: 0, kind: input, shape index: {}]   ;;  %s2482_s1 = inlined_call_operand.hbm [shape: bf16[128,128], index: 1, kind: input, shape index: {}]   ;;  %s2483_s2 = inlined_call_operand.vmem [shape: f32[1,128], index: 2, kind: input, shape index: {}]   ;;  %s2484_s3 = inlined_call_operand.vmem [shape: f32[1,128], index: 3, kind: input, shape index: {}]   ;;  %s2485_s4 = inlined_call_operand.vmem [shape: f32[1,128], index: 4, kind: input, shape index: {}]   ;;  %s2486_s5 = inlined_call_operand.hbm [shape: bf16[128,128], index: 5, kind: input, shape index: {}]   ;;  %s2487_s6 = inlined_call_operand.vmem [shape: f32[1,128], index: 6, kind: input, shape index: {}]   ;;  %s2488_s7 = inlined_call_operand.hbm [shape: bf16[128,128], index: 7, kind: input, shape index: {}]   ;;  %s2489_s8 = inlined_call_operand.vmem [shape: f32[1,128], index: 8, kind: input, shape index: {}]   ;;  %s2490_s9 = inlined_call_operand.hbm [shape: f32[128,128], index: 9, kind: output, shape index: {0}]   ;;  %s2491_s10 = inlined_call_operand.hbm [shape: f32[16,128], index: 10, kind: output, shape index: {1}]   ;;  %s2492_s11 = inlined_call_operand.hbm [shape: f32[16,128], index: 11, kind: output, shape index: {2}]   ;;  %s2493_s12 = inlined_call_operand.hbm [shape: f32[16,128], index: 12, kind: output, shape index: {3}]   ;;  %s2494_s13 = inlined_call_operand.hbm [shape: f32[16,128], index: 13, kind: output, shape index: {4}]  }
   0x1   :  { %2508 = sst [smem:[#allocation27_spill]] %s2481_s0 }
   0x2   :  { %2509 = sst [smem:[#allocation28_spill]] %s2482_s1 }
   0x3   :  { %2510 = sst [smem:[#allocation29_spill]] %s2483_s2 }
   0x4   :  { %2511 = sst [smem:[#allocation30_spill]] %s2484_s3 }
   0x5   :  { %2512 = sst [smem:[#allocation31_spill]] %s2486_s5 }
   0x6   :  { %2513 = sst [smem:[#allocation32_spill]] %s2488_s7 }
   0x7   :  { %19 = vsyncpa [#allocation3], 0 }
   0x8   :  { %21 = vsyncpa [#allocation3 + $0x1], 0 }
   0x9   :  { %22 = vsyncpa [#allocation6], 0 }
   0xa   :  { %23 = vsyncpa [#allocation9], 0 }
   0xb   :  { %24 = vsyncpa [#allocation4], 0 }
   0xc   :  { %26 = vsyncpa [#allocation4 + $0x1], 0 }
   0xd   :  { %27 = vsyncpa [#allocation12], 0 }
   0xe   :  { %29 = vsyncpa [#allocation12 + $0x1], 0 }
   0xf   :  { %30 = vsyncpa [#allocation15], 0 }
  0x10   :  { %32 = vsyncpa [#allocation15 + $0x1], 0  ;;  %s2096_s25 = smov 0   ;;  %s2098_s26 = smov 0  }
  0x11   :  { %s2100_s27 = smov 0   ;;  %s2102_s28 = smov 0  }
  0x12 LB: > { %2514 = sst [smem:[#allocation23_spill]] %s1997_s25  ;;  %s2117_s29 = sadd.s32 4294967295, %s2009_s28   ;;  %s2009_s28 = sphi %s2102_s28, %s2551_s28   ;;  %s2005_s27 = sphi %s2100_s27, %s2548_s27   ;;  %s2001_s26 = sphi %s2098_s26, %s2550_s26   ;;  %s1997_s25 = sphi %s2096_s25, %s2549_s25  }
  0x13   : > { %2515 = sst [smem:[#allocation24_spill]] %s2005_s27  ;;  %s2495_s30 = sadd.s32 4294967294, %s2009_s28  }
  0x14   : > { %p58_p0 = scmp.ne.s32.totalorder %s2001_s26, %s1997_s25  ;;  %p2498_p1 = scmp.eq.s32.totalorder %s2117_s29, 0 }
  0x15   : > { %p250_p2 = scmp.eq.s32.totalorder %s2117_s29, 1  ;;  %p256_p3 = scmp.eq.s32.totalorder %s2495_s30, 1 }
  0x16   : > { %p2128_p4 = por %p2498_p1, %p58_p0  ;;  %p1428_p5 = scmp.ge.s32.totalorder %s2009_s28, 1 }
  0x17   : > { %p2133_p6 = por %p256_p3, %p58_p0  ;;  %p367_p7 = scmp.lt.s32.totalorder %s2009_s28, 3 }
  0x18   : > { %s2516_s14 = scalar_select %p2128_p4, 1, 0 }
  0x19   : > { %s2517_s15 = scalar_select %p2133_p6, 1, 0 }
  0x1a   : > { %p2138_p8 = pnand %p1428_p5, %p367_p7  ;;  %s2011_s17 = smov [#allocation5]  }
  0x1b   : > { %2518 = sst [smem:[#allocation25_spill]] %s2517_s15  ;;  %s379_s18 = sshll.u32 %s2011_s17, 4  ;;  %s380_s18 = int_to_ptr.vmem [resolvable:$true] %s379_s18 }
  0x1c   : > { %s2519_s16 = scalar_select %p2138_p8, 1, 0 }
  0x1d   : > { %p1612_p9 = pneg %p2138_p8  ;;  %s2012_s20 = smov [#allocation7]  }
  0x1e   : > { %s401_s21 = sshll.u32 %s2012_s20, 4  ;;  %s2013_s22 = smov [#allocation8]   ;;  %s402_s21 = int_to_ptr.vmem [resolvable:$true] %s401_s21 }
  0x1f   : > { %p2147_p11 = pnand %p1612_p9, %p2498_p1  ;;  %s417_s23 = sshll.u32 %s2013_s22, 4  ;;  %s418_s23 = int_to_ptr.vmem [resolvable:$true] %s417_s23 }
  0x20   : > { %s1730_s24 = scalar_lea.vmem %s380_s18, 1024  ;;  %p1738_p5 = scmp.lt.s32.totalorder %s380_s18, %s380_s18 }
  0x21   : > { %p1721_p12 = pneg %p2147_p11  ;;  %p1731_p13 = scmp.ne.s32.totalorder %s380_s18, %s1730_s24 }
  0x22   : > { %p1739_p7 = scmp.lt.s32.totalorder %s1730_s24, %s1730_s24 }
  0x23   : > { %p1733_p0 = pnand %p1731_p13, %p1721_p12 }
  0x24   : > { %p1740_p9 = por %p1739_p7, %p1738_p5 }
  0x25   : > { %p1734_p3 = pneg %p1733_p0 }
  0x27   : > { %p1741_p10 = pnand %p1740_p9, %p1734_p3 }
  0x29   : > { %1744 = shalt.err (!%p1741_p10)
}
  0x2a   : > { %s2499_s17 = smov 64   ;;  %s2500_s20 = smov 4  }
  0x2b   : > { %s2521_s1 = sld [smem:[#allocation28_spill]]  ;;  %s1756_s15 = scalar_lea.vmem %s402_s21, 1024 }
  0x2c   : > { %p1757_p13 = scmp.ne.s32.totalorder %s402_s21, %s1756_s15  ;;  %p1764_p3 = scmp.lt.s32.totalorder %s402_s21, %s402_s21 }
  0x2d   : > { %p1765_p10 = scmp.lt.s32.totalorder %s1756_s15, %s1756_s15 }
  0x2e   : > { %p1759_p0 = pnand %p1757_p13, %p1721_p12 }
  0x2f   : > { %p1766_p7 = por %p1765_p10, %p1764_p3 }
  0x30   : > { %p1760_p5 = pneg %p1759_p0 }
  0x31   : > { %1615 = dma.hbm_to_vmem [thread:$0]  (!%p2147_p11), %s2521_s1, 1024, %s380_s18, [#allocation6], %s2499_s17, %s2499_s17, %s2500_s20  }
  0x32   : > { %p1767_p9 = pnand %p1766_p7, %p1760_p5 }
  0x34   : > { %1770 = shalt.err (!%p1767_p9)
}
  0x35   : > { %s2522_s5 = sld [smem:[#allocation31_spill]]  ;;  %s1782_s30 = scalar_lea.vmem %s418_s23, 1024 }
  0x36   : > { %p1783_p1 = scmp.ne.s32.totalorder %s418_s23, %s1782_s30  ;;  %p1790_p3 = scmp.lt.s32.totalorder %s418_s23, %s418_s23 }
  0x37   : > { %p1791_p5 = scmp.lt.s32.totalorder %s1782_s30, %s1782_s30 }
  0x38   : > { %p1785_p13 = pnand %p1783_p1, %p1721_p12 }
  0x39   : > { %p1792_p10 = por %p1791_p5, %p1790_p3 }
  0x3a   : > { %p1786_p0 = pneg %p1785_p13 }
  0x3b   : > { %1618 = dma.hbm_to_vmem [thread:$0]  (!%p2147_p11), %s2522_s5, 1024, %s402_s21, [#allocation6], %s2499_s17, %s2499_s17, %s2500_s20  }
  0x3c   : > { %p1793_p7 = pnand %p1792_p10, %p1786_p0 }
  0x3e   : > { %1796 = shalt.err (!%p1793_p7)
}
  0x3f   : > { %s2523_s7 = sld [smem:[#allocation32_spill]]  ;;  %s2187_s18 = sadd.s32 1, %s2009_s28  }
  0x40   : > { %s42_s19 = ssub.s32 %s2009_s28, %s2187_s18  ;;  %s45_s21 = sadd.s32 1, %s2005_s27 }
  0x41   : > { %p43_p1 = scmp.eq.s32.totalorder %s42_s19, 0  ;;  %p52_p12 = scmp.ne.s32.totalorder %s2005_s27, %s2001_s26 }
  0x42   : > { %p53_p9 = scmp.eq.s32.totalorder %s2009_s28, 0  ;;  %p1645_p13 = scmp.lt.s32.totalorder %s2009_s28, 2 }
  0x43   : > { %s2197_s22 = scalar_select %p43_p1, %s2005_s27, %s45_s21  }
  0x44   : > { %p54_p0 = por %p53_p9, %p52_p12  ;;  %p2201_p3 = por %p250_p2, %p52_p12 }
  0x45   : > { %1621 = dma.hbm_to_vmem [thread:$0]  (!%p2147_p11), %s2523_s7, 1024, %s418_s23, [#allocation9], %s2499_s17, %s2499_s17, %s2500_s20  }
  0x46   : > { %2524 = sst [smem:[#allocation26_spill]] %s2197_s22  ;;  %s434_s30 = sand.u32 1, %s2005_s27  }
  0x47   : > { %s2525_s24 = scalar_select %p2201_p3, 1, 0 }
  0x48   : > { %s1492_s25 = sshll.u32 %s2009_s28, 9  ;;  %s1433_s23 = sshll.u32 %s434_s30, 5 }
  0x49   : > { %s2526_s0 = sld [smem:[#allocation27_spill]]  ;;  %s438_s19 = scalar_lea.vmem [#allocation2], %s1433_s23 }
  0x4a   : > { %s445_s21 = sshll.u32 %s438_s19, 4  ;;  %p2212_p11 = pnand %p1645_p13, %p54_p0  ;;  %s2216_s21 = int_to_ptr.vmem [resolvable:$true] %s445_s21 }
  0x4b   : > { %s2218_s5 = scalar_lea.sflag [#allocation3], %s434_s30 }
  0x4c   : > { %p1799_p5 = pneg %p2212_p11 }
  0x4f   : > { %s2210_s20 = scalar_lea.hbm %s2526_s0, %s1492_s25  ;;  %s1802_s23 = scalar_lea.hbm %s2526_s0, 1024 }
  0x50   : > { %s1797_s7 = scalar_lea.hbm %s2210_s20, 512  ;;  %p1803_p1 = scmp.lt.s32.totalorder %s2210_s20, %s2526_s0 }
  0x51   : > { %p1798_p2 = scmp.ne.s32.totalorder %s2210_s20, %s1797_s7  ;;  %p1804_p12 = scmp.lt.s32.totalorder %s1802_s23, %s1797_s7 }
  0x53   : > { %p1800_p10 = pnand %p1799_p5, %p1798_p2  ;;  %p1805_p9 = por %p1804_p12, %p1803_p1 }
  0x55   : > { %p1801_p7 = pneg %p1800_p10 }
  0x57   : > { %p1806_p13 = pnand %p1805_p9, %p1801_p7 }
  0x59   : > { %1809 = shalt.err (!%p1806_p13)
}
  0x5a   : > { %s1810_s30 = scalar_lea.vmem %s2216_s21, 512  ;;  %s2016_s22 = smov [#allocation2]  }
  0x5b   : > { %p1811_p0 = scmp.ne.s32.totalorder %s2216_s21, %s1810_s30  ;;  %s1815_s27 = sshll.u32 %s2016_s22, 4  ;;  %s1816_s27 = int_to_ptr.vmem [resolvable:$false] %s1815_s27 }
  0x5c   : > { %s1817_s17 = scalar_lea.vmem %s1816_s27, 1024  ;;  %p1818_p10 = scmp.lt.s32.totalorder %s2216_s21, %s1816_s27 }
  0x5d   : > { %p1813_p6 = pnand %p1811_p0, %p1799_p5  ;;  %p1819_p3 = scmp.lt.s32.totalorder %s1817_s17, %s1810_s30 }
  0x5f   : > { %p1814_p2 = pneg %p1813_p6  ;;  %p1820_p4 = por %p1819_p3, %p1818_p10 }
  0x61   : > { %p1821_p8 = pnand %p1820_p4, %p1814_p2 }
  0x63   : > { %1824 = shalt.err (!%p1821_p8)
}
  0x64   : > { %s2528_s7 = smov 4   ;;  %s2529_s25 = smov 64  }
  0x65   : > { %1625 = dma.hbm_to_vmem [thread:$0]  (!%p2212_p11), %s2210_s20, 512, %s2216_s21, %s2218_s5, %s2529_s25, %s2529_s25, %s2528_s7  }
  0x66   : > { %p2530_p6 = scmp.ne.s32.totalorder %s2519_s16, 0 }
  0x67   : > { %s2245_s22 = sand.u32 (!%p2530_p6), 1, %s2001_s26   ;;  %p2531_p4 = scmp.ne.s32.totalorder (!%p2530_p6), %s2516_s14, 0 }
  0x68   : > { %457 = sbr.rel (%p2530_p6) target bundleno = 792 (0x318), region = 56  ;;  %s1437_s27 = sshll.u32 (!%p2530_p6), %s2245_s22, 5 }
  0x69   : > { %s460_s23 = scalar_lea.sflag (!%p2530_p6), [#allocation3], %s2245_s22  ;;  %s2249_s15 = scalar_lea.vmem (!%p2530_p6), [#allocation2], %s1437_s27 }
  0x6d   : > { %1972 = dma.done.wait (%p2531_p4), %s460_s23, 512  }
  0x6e   : > { %1974 = vsyncadd (%p2531_p4), %s460_s23, 4294966784  ;;  %p2532_p8 = scmp.eq.s32.totalorder %s2117_s29, 0 }
  0x70   : > { %1976 = dma.done.wait (%p2532_p8), [#allocation6], 2048   ;;  %p2533_p3 = pmov %p2532_p8 }
  0x72   : > { %1978 = vsyncadd (%p2533_p3), [#allocation6], 4294965248  ;;  %p2534_p11 = pmov %p2533_p3 }
  0x73   : > { %p2535_p5 = pmov %p2533_p3 }
  0x74   : > { %1980 = dma.done.wait (%p2534_p11), [#allocation9], 1024  }
  0x75   : > { %1982 = vsyncadd (%p2535_p5), [#allocation9], 4294966272  ;;  %v1691_v0 = vld [vmem:[#allocation5 + $0x38] sm:$0xff]   ;;  %v1692_v1 = vld [vmem:[#allocation5 + $0x30] sm:$0xff]   ;;  %v2017_v13 = vmov 0.0   ;;  %vm2018_vm0 = vmmov 0  }
  0x76   : > { %1524 = vmatprep.subr.bf16.mxu0 %v1691_v0  ;;  %v1693_v2 = vld [vmem:[#allocation5 + $0x28] sm:$0xff]   ;;  %v1694_v3 = vld [vmem:[#allocation5 + $0x20] sm:$0xff]   ;;  %v1695_v5 = vld [vmem:[#allocation5 + $0x18] sm:$0xff]   ;;  %1548 = vmatprep.subr.bf16.mxu1 %v2017_v13  ;;  %s2536_s2 = sld [smem:[#allocation29_spill]]  ;;  %s1441_s14 = sshll.u32 %s2245_s22, 6  ;;  %vm789_vm1 = vcmask 1041409  }
  0x77   : > { %1525 = vmatpush3.bf16.msra.mxu0 %v1691_v0  ;;  %v1699_v4 = vld [vmem:[%s2249_s15] sm:$0xff]   ;;  %v1696_v6 = vld [vmem:[#allocation5 + $0x10] sm:$0xff]   ;;  %v1697_v7 = vld [vmem:[#allocation5 + $0x8] sm:$0xff]   ;;  %1564 = vmatprep.mubr.msk.bf16.mxu1 %vm2018_vm0, %v2017_v13  ;;  %s2271_s16 = scalar_lea.vmem [#allocation10], %s1441_s14  ;;  %s2537_s3 = sld [smem:[#allocation30_spill]]  ;;  %vm791_vm2 = vcmask 1042434  }
  0x78   : > { %1526 = vmatprep.subr.bf16.mxu0 %v1692_v1  ;;  %1540 = vmatprep.mubr.bf16.mxu0 %v1699_v4  ;;  %v1698_v8 = vld [vmem:[#allocation5] sm:$0xff]   ;;  %v1700_v9 = vld [vmem:[%s2249_s15 + $0x8] sm:$0xff]   ;;  %v1701_v10 = vld [vmem:[%s2249_s15 + $0x10] sm:$0xff]   ;;  %vm793_vm3 = vcmask 1043459   ;;  %vm795_vm4 = vcmask 1044484   ;;  %vm797_vm5 = vcmask 1045509  }
  0x79   : > { %v1702_v11 = vld [vmem:[%s2249_s15 + $0x18] sm:$0xff]   ;;  %v1704_v14 = vld [vmem:[#allocation7 + $0x30] sm:$0xff]   ;;  %v1705_v15 = vld [vmem:[#allocation7 + $0x28] sm:$0xff]   ;;  %vm799_vm6 = vcmask 1046534   ;;  %vm801_vm7 = vcmask 1047559   ;;  %s2302_s17 = sshll.u32 %s2245_s22, 3 }
  0x7a   : > { %v1703_v12 = vld [vmem:[#allocation7 + $0x38] sm:$0xff]   ;;  %v1706_v16 = vld [vmem:[#allocation7 + $0x20] sm:$0xff]   ;;  %v1708_v18 = vld [vmem:[#allocation7 + $0x10] sm:$0xff]   ;;  %s516_s7 = scalar_lea.vmem [#allocation11], %s2302_s17  ;;  %s2505_s25 = scalar_lea.vmem [#allocation13], %s2302_s17 }
  0x7b   : > { %1527 = vmatpush3.bf16.msra.mxu0 %v1692_v1  ;;  %1549 = vmatpush3.bf16.msra.mxu1 %v1703_v12  ;;  %v1707_v17 = vld [vmem:[#allocation7 + $0x18] sm:$0xff]   ;;  %v1709_v19 = vld [vmem:[#allocation7 + $0x8] sm:$0xff]   ;;  %v1710_v20 = vld [vmem:[#allocation7] sm:$0xff]   ;;  %s2506_s15 = scalar_lea.vmem [#allocation14], %s2302_s17  ;;  %s1151_s1 = sshll.u32 %s2271_s16, 4  ;;  %s2334_s1 = int_to_ptr.vmem [resolvable:$true] %s1151_s1 }
  0x7c   : > { %1528 = vmatprep.subr.bf16.mxu0 %v1693_v2  ;;  %1550 = vmatprep.subr.bf16.mxu1 %v2017_v13  ;;  %v1711_v21 = vld [vmem:[#allocation8 + $0x38] sm:$0xff]   ;;  %v1712_v22 = vld [vmem:[#allocation8 + $0x30] sm:$0xff]   ;;  %v1713_v23 = vld [vmem:[#allocation8 + $0x28] sm:$0xff]   ;;  %s2507_s5 = sand.u32 1, %s2117_s29   ;;  %s2338_s14 = sshll.u32 %s2117_s29, 7 }
  0x7d   : > { %v1714_v24 = vld [vmem:[#allocation8 + $0x20] sm:$0xff]   ;;  %v1715_v25 = vld [vmem:[#allocation8 + $0x18] sm:$0xff]   ;;  %v1716_v26 = vld [vmem:[#allocation8 + $0x10] sm:$0xff]   ;;  %s1165_s19 = scalar_lea.hbm %s2491_s10, %s2338_s14  ;;  %s1167_s30 = sshll.u32 %s516_s7, 4  ;;  %s1168_s30 = int_to_ptr.vmem [resolvable:$true] %s1167_s30 }
  0x7e   : > { %v1717_v27 = vld [vmem:[#allocation8 + $0x8] sm:$0xff]   ;;  %v1446_v28 = vld [vmem:[%s2536_s2] ss:$0 sm:$0xff]  ;;  %s2348_s27 = scalar_lea.sflag [#allocation12], %s2507_s5  ;;  %s1825_s23 = scalar_lea.vmem %s1168_s30, 128 }
  0x7f   : > { %1529 = vmatpush3.bf16.msra.mxu0 %v1693_v2  ;;  %1551 = vmatpush3.bf16.msra.mxu1 %v1704_v14  ;;  %p1826_p7 = scmp.ne.s32.totalorder %s1168_s30, %s1825_s23  ;;  %p2538_p1 = scmp.ne.s32.totalorder %s2525_s24, 0 }
  0x80   : > { %1530 = vmatprep.subr.bf16.mxu0 %v1694_v3  ;;  %1552 = vmatprep.subr.bf16.mxu1 %v2017_v13 }
  0x81   : > { %p1827_p12 = pnand %p1826_p7, %p2538_p1 }
  0x83   : > { %1531 = vmatpush3.bf16.msra.mxu0 %v1694_v3  ;;  %1553 = vmatpush3.bf16.msra.mxu1 %v1705_v15  ;;  %p1828_p9 = pneg %p1827_p12 }
  0x84   : > { %1532 = vmatprep.subr.bf16.mxu0 %v1695_v5  ;;  %1554 = vmatprep.subr.bf16.mxu1 %v2017_v13 }
  0x87   : > { %1533 = vmatpush3.bf16.msra.mxu0 %v1695_v5  ;;  %1555 = vmatpush3.bf16.msra.mxu1 %v1706_v16 }
  0x88   : > { %1534 = vmatprep.subr.bf16.mxu0 %v1696_v6  ;;  %1556 = vmatprep.subr.bf16.mxu1 %v2017_v13 }
  0x8b   : > { %1535 = vmatpush3.bf16.msra.mxu0 %v1696_v6  ;;  %1557 = vmatpush3.bf16.msra.mxu1 %v1707_v17 }
  0x8c   : > { %1536 = vmatprep.subr.bf16.mxu0 %v1697_v7  ;;  %1558 = vmatprep.subr.bf16.mxu1 %v2017_v13 }
  0x8f   : > { %1537 = vmatpush3.bf16.msra.mxu0 %v1697_v7  ;;  %1559 = vmatpush3.bf16.msra.mxu1 %v1708_v18 }
  0x90   : > { %1538 = vmatprep.subr.bf16.mxu0 %v1698_v8  ;;  %1560 = vmatprep.subr.bf16.mxu1 %v2017_v13 }
  0x93   : > { %1539 = vmatpush3.bf16.msra.mxu0 %v1698_v8  ;;  %1561 = vmatpush3.bf16.msra.mxu1 %v1709_v19 }
  0x94   : > { %1568 = vmatprep.subr.bf16.mxu0 %v2017_v13  ;;  %1562 = vmatprep.subr.bf16.mxu1 %v2017_v13 }
  0x96   : > { %1541 = vmatmul.mubr.bf16.vlgmr.msra.gmra.mxu0 %v1700_v9 }
  0x97   : > { %1544 = vmatprep.mubr.bf16.mxu0 %v1701_v10  ;;  %1563 = vmatpush3.bf16.msra.mxu1 %v1710_v20 }
  0x98   : > { %1569 = vmatpush3.bf16.msra.mxu0 %v1711_v21 }
  0x99   : > { %1570 = vmatprep.subr.bf16.mxu0 %v2017_v13 }
  0x9c   : > { %1571 = vmatpush3.bf16.msra.mxu0 %v1712_v22 }
  0x9d   : > { %1572 = vmatprep.subr.bf16.mxu0 %v2017_v13 }
  0x9e   : > { %1545 = vmatmul.mubr.bf16.gmra.mxu0 %v1702_v11 }
  0x9f   : > { %1584 = vmatprep.mubr.msk.bf16.mxu0 %vm2018_vm0, %v2017_v13 }
  0xa0   : > { %1573 = vmatpush3.bf16.msra.mxu0 %v1713_v23 }
  0xa1   : > { %1574 = vmatprep.subr.bf16.mxu0 %v2017_v13 }
  0xa4   : > { %1575 = vmatpush3.bf16.msra.mxu0 %v1714_v24 }
  0xa5   : > { %1576 = vmatprep.subr.bf16.mxu0 %v2017_v13 }
  0xa8   : > { %1577 = vmatpush3.bf16.msra.mxu0 %v1715_v25 }
  0xa9   : > { %1578 = vmatprep.subr.bf16.mxu0 %v2017_v13 }
  0xac   : > { %1579 = vmatpush3.bf16.msra.mxu0 %v1716_v26  ;;  %v2284_v26 = vld [vmem:[%s2537_s3] ss:$0 sm:$0xff] }
  0xad   : > { %1580 = vmatprep.subr.bf16.mxu0 %v2017_v13 }
  0xb0   : > { %1581 = vmatpush3.bf16.msra.mxu0 %v1717_v27 }
  0xb1   : > { %1582 = vmatprep.subr.bf16.mxu0 %v2017_v13 }
 0x156   : > { %v1542_v29 = vpop.f32.mrf.mxu0 }
 0x157   : > { %v687_v30 = vadd.f32 %v1542_v29, %v1446_v28 }
 0x158   : > { %v678_v31 = vpop.f32.mrf.mxu0 }
 0x159   : > { %v711_v32 = vmax.f32 %v687_v30, 0.0  ;;  %v679_v33 = vadd.f32 %v1446_v28, %v678_v31 }
 0x15a   : > { %v1543_v34 = vpop.f32.mrf.mxu0 }
 0x15b   : > { %719 = vst [vmem:[%s2271_s16 + $0x10] sm:$0xff] %v711_v32  ;;  %v737_v35 = vrot.slane %v711_v32, 4  ;;  %v709_v36 = vmax.f32 %v679_v33, 0.0  ;;  %v690_v37 = vadd.f32 %v1543_v34, %v1446_v28 }
 0x15c   : > { %v681_v38 = vpop.f32.mrf.mxu0 }
 0x15d   : > { %v738_v39 = vadd.f32 %v737_v35, %v711_v32  ;;  %717 = vst [vmem:[%s2271_s16] sm:$0xff] %v709_v36  ;;  %v725_v40 = vrot.slane %v709_v36, 4  ;;  %v712_v41 = vmax.f32 %v690_v37, 0.0  ;;  %v682_v42 = vadd.f32 %v1446_v28, %v681_v38  ;;  %v1460_v35 = vld [vmem:[%s2485_s4] ss:$0 sm:$0xff] }
 0x15e   : > { %v1546_v43 = vpop.f32.mrf.mxu0 }
 0x15f   : > { %v739_v44 = vrot.slane %v738_v39, 2  ;;  %v726_v45 = vadd.f32 %v725_v40, %v709_v36  ;;  %720 = vst [vmem:[%s2271_s16 + $0x18] sm:$0xff] %v712_v41  ;;  %v743_v46 = vrot.slane %v712_v41, 4  ;;  %v710_v47 = vmax.f32 %v682_v42, 0.0 }
 0x160   : > { %v703_v48 = vadd.f32 %v1546_v43, %v1446_v28  ;;  %v694_v49 = vpop.f32.mrf.mxu0 }
 0x161   : > { %v740_v50 = vadd.f32 %v739_v44, %v738_v39  ;;  %v727_v51 = vrot.slane %v726_v45, 2  ;;  %v744_v52 = vadd.f32 %v743_v46, %v712_v41  ;;  %718 = vst [vmem:[%s2271_s16 + $0x8] sm:$0xff] %v710_v47  ;;  %v731_v53 = vrot.slane %v710_v47, 4 }
 0x162   : > { %v715_v54 = vmax.f32 %v703_v48, 0.0  ;;  %v695_v55 = vadd.f32 %v1446_v28, %v694_v49  ;;  %v1547_v56 = vpop.f32.mrf.mxu0 }
 0x163   : > { %v728_v57 = vadd.f32 %v727_v51, %v726_v45  ;;  %v745_v58 = vrot.slane %v744_v52, 2  ;;  %v732_v59 = vadd.f32 %v731_v53, %v710_v47  ;;  %v706_v62 = vadd.f32 %v1547_v56, %v1446_v28 }
 0x164   : > { %723 = vst [vmem:[%s2271_s16 + $0x30] sm:$0xff] %v715_v54  ;;  %v761_v60 = vrot.slane %v715_v54, 4  ;;  %v713_v61 = vmax.f32 %v695_v55, 0.0  ;;  %v697_v63 = vpop.f32.mrf.mxu0  ;;  %v741_v0 = vrot.slane %v740_v50, 1 }
 0x165   : > { %v729_v1 = vrot.slane %v728_v57, 1  ;;  %v746_v2 = vadd.f32 %v745_v58, %v744_v52  ;;  %v733_v3 = vrot.slane %v732_v59, 2  ;;  %v716_v6 = vmax.f32 %v706_v62, 0.0 }
 0x166   : > { %v762_v4 = vadd.f32 %v761_v60, %v715_v54  ;;  %721 = vst [vmem:[%s2271_s16 + $0x20] sm:$0xff] %v713_v61  ;;  %v749_v5 = vrot.slane %v713_v61, 4  ;;  %v698_v7 = vadd.f32 %v1446_v28, %v697_v63  ;;  %v742_v14 = vadd.f32 %v741_v0, %v740_v50 }
 0x167   : > { %v747_v8 = vrot.slane %v746_v2, 1  ;;  %v734_v9 = vadd.f32 %v733_v3, %v732_v59  ;;  %724 = vst [vmem:[%s2271_s16 + $0x38] sm:$0xff] %v716_v6  ;;  %v767_v12 = vrot.slane %v716_v6, 4  ;;  %v730_v15 = vadd.f32 %v729_v1, %v728_v57 }
 0x168   : > { %v763_v10 = vrot.slane %v762_v4, 2  ;;  %v750_v11 = vadd.f32 %v749_v5, %v713_v61  ;;  %v714_v13 = vmax.f32 %v698_v7, 0.0  ;;  %v775_v23 = vmul.f32 0.125, %v742_v14 }
 0x169   : > { %v748_v16 = vadd.f32 %v747_v8, %v746_v2  ;;  %v735_v17 = vrot.slane %v734_v9, 1  ;;  %v768_v19 = vadd.f32 %v767_v12, %v716_v6  ;;  %v773_v24 = vmul.f32 0.125, %v730_v15 }
 0x16a   : > { %v751_v18 = vrot.slane %v750_v11, 2  ;;  %722 = vst [vmem:[%s2271_s16 + $0x28] sm:$0xff] %v714_v13  ;;  %v764_v20 = vadd.f32 %v763_v10, %v762_v4  ;;  %v755_v32 = vrot.slane %v714_v13, 4  ;;  %v814_v34 = vmul.f32 %v2284_v26, %v775_v23  ;;  %s2019_s16 = smov [#allocation11]  }
 0x16b   : > { %v736_v21 = vadd.f32 %v735_v17, %v734_v9  ;;  %v769_v25 = vrot.slane %v768_v19, 2  ;;  %v776_v27 = vmul.f32 0.125, %v748_v16  ;;  %v812_v36 = vmul.f32 %v2284_v26, %v773_v24 }
 0x16c   : > { %v752_v22 = vadd.f32 %v751_v18, %v750_v11  ;;  %v765_v29 = vrot.slane %v764_v20, 1  ;;  %v859_v39 = vpack.c.bf16 %v773_v24, %v773_v24  ;;  %v756_v42 = vadd.f32 %v755_v32, %v714_v13 }
 0x16d   : > { %v774_v28 = vmul.f32 0.125, %v736_v21  ;;  %v770_v31 = vadd.f32 %v769_v25, %v768_v19  ;;  %v815_v43 = vmul.f32 %v2284_v26, %v776_v27  ;;  %v861_v50 = vpack.c.bf16 %v775_v23, %v775_v23 }
 0x16e   : > { %v753_v30 = vrot.slane %v752_v22, 1  ;;  %v766_v44 = vadd.f32 %v765_v29, %v764_v20  ;;  %v757_v49 = vrot.slane %v756_v42, 2  ;;  %v829_v52 = vadd.f32 %v1460_v35, %v814_v34 }
 0x16f   : > { %v813_v33 = vmul.f32 %v2284_v26, %v774_v28  ;;  %v860_v37 = vpack.c.bf16 %v774_v28, %v774_v28  ;;  %v771_v41 = vrot.slane %v770_v31, 1  ;;  %v790_v46 = vsel %vm789_vm1, %v774_v28, %v773_v24 }
 0x170   : > { %v754_v38 = vadd.f32 %v753_v30, %v752_v22  ;;  %v827_v53 = vadd.f32 %v1460_v35, %v812_v36  ;;  %v898_v54 = vunpack.c.l.b16 %v859_v39  ;;  %v758_v55 = vadd.f32 %v757_v49, %v756_v42 }
 0x171   : > { %v828_v40 = vadd.f32 %v1460_v35, %v813_v33  ;;  %v899_v47 = vunpack.c.l.b16 %v860_v37  ;;  %v772_v48 = vadd.f32 %v771_v41, %v770_v31  ;;  %v862_v56 = vpack.c.bf16 %v776_v27, %v776_v27 }
 0x172   : > { %v777_v45 = vmul.f32 0.125, %v754_v38  ;;  %v792_v57 = vsel %vm791_vm2, %v775_v23, %v790_v46  ;;  %v779_v58 = vmul.f32 0.125, %v766_v44  ;;  %v830_v60 = vadd.f32 %v1460_v35, %v815_v43  ;;  %v1718_v44 = vld [vmem:[#allocation8] sm:$0xff]  }
 0x173   : > { %v843_v51 = vrot.slane %v828_v40, 7  ;;  %v780_v61 = vmul.f32 0.125, %v772_v48  ;;  %v759_v62 = vrot.slane %v758_v55, 1  ;;  %v906_v63 = vsel %vm789_vm1, %v899_v47, %v898_v54  ;;  %1583 = vmatpush3.bf16.msra.mxu0 %v1718_v44 }
 0x174   : > { %v816_v59 = vmul.f32 %v2284_v26, %v777_v45  ;;  %v900_v0 = vunpack.c.l.b16 %v861_v50  ;;  %v863_v2 = vpack.c.bf16 %v777_v45, %v777_v45  ;;  %v845_v3 = vrot.slane %v829_v52, 6 }
 0x175   : > { %v844_v1 = vsel %vm789_vm1, %v843_v51, %v827_v53  ;;  %v760_v4 = vadd.f32 %v759_v62, %v758_v55  ;;  %v794_v5 = vsel %vm793_vm3, %v776_v27, %v792_v57  ;;  %v901_v6 = vunpack.c.l.b16 %v862_v56 }
 0x176   : > { %v818_v7 = vmul.f32 %v2284_v26, %v779_v58  ;;  %v831_v8 = vadd.f32 %v1460_v35, %v816_v59  ;;  %v907_v9 = vsel %vm791_vm2, %v900_v0, %v906_v63  ;;  %v847_v10 = vrot.slane %v830_v60, 5 }
 0x177   : > { %v819_v11 = vmul.f32 %v2284_v26, %v780_v61  ;;  %v778_v12 = vmul.f32 0.125, %v760_v4  ;;  %v846_v13 = vsel %vm791_vm2, %v845_v3, %v844_v1  ;;  %v902_v14 = vunpack.c.l.b16 %v863_v2 }
 0x178   : > { %v865_v15 = vpack.c.bf16 %v779_v58, %v779_v58  ;;  %v866_v16 = vpack.c.bf16 %v780_v61, %v780_v61  ;;  %v796_v17 = vsel %vm795_vm4, %v777_v45, %v794_v5  ;;  %v908_v20 = vsel %vm793_vm3, %v901_v6, %v907_v9  ;;  %v1461_v45 = vld [vmem:[%s2487_s6] ss:$0 sm:$0xff] }
 0x179   : > { %v817_v18 = vmul.f32 %v2284_v26, %v778_v12  ;;  %v864_v19 = vpack.c.bf16 %v778_v12, %v778_v12  ;;  %v798_v21 = vsel %vm797_vm5, %v778_v12, %v796_v17  ;;  %v849_v22 = vrot.slane %v831_v8, 4 }
 0x17a   : > { %v833_v23 = vadd.f32 %v1460_v35, %v818_v7  ;;  %v848_v24 = vsel %vm793_vm3, %v847_v10, %v846_v13  ;;  %v800_v25 = vsel %vm799_vm6, %v779_v58, %v798_v21  ;;  %v834_v28 = vadd.f32 %v1460_v35, %v819_v11 }
 0x17b   : > { %v832_v27 = vadd.f32 %v1460_v35, %v817_v18  ;;  %v903_v29 = vunpack.c.l.b16 %v864_v19  ;;  %v802_v30 = vsel %vm801_vm7, %v780_v61, %v800_v25  ;;  %v904_v31 = vunpack.c.l.b16 %v865_v15 }
 0x17c   : > { %v909_v32 = vsel %vm795_vm4, %v902_v14, %v908_v20  ;;  %804 = vst [vmem:[%s516_s7] sm:$0xff] %v802_v30  ;;  %v905_v33 = vunpack.c.l.b16 %v866_v16  ;;  %v850_v36 = vsel %vm795_vm4, %v849_v22, %v848_v24  ;;  %v853_v37 = vrot.slane %v833_v23, 2 }
 0x17d   : > { %v851_v26 = vrot.slane %v832_v27, 3  ;;  %v910_v34 = vsel %vm797_vm5, %v903_v29, %v909_v32  ;;  %v855_v39 = vrot.slane %v834_v28, 1 }
 0x17e   : > { %v911_v35 = vsel %vm799_vm6, %v904_v31, %v910_v34 }
 0x17f   : > { %v852_v38 = vsel %vm797_vm5, %v851_v26, %v850_v36  ;;  %v912_v40 = vsel %vm801_vm7, %v905_v33, %v911_v35 }
 0x180   : > { %v854_v41 = vsel %vm799_vm6, %v853_v37, %v852_v38  ;;  %v913_v42 = vpack.c.b16 %v912_v40, %v912_v40 }
 0x181   : > { %v856_v43 = vsel %vm801_vm7, %v855_v39, %v854_v41 }
 0x182   : > { %1565 = vmatmul.mubr.bf16.vlgmr.msra.gmra.mxu1 %v913_v42  ;;  %858 = vst [vmem:[%s2505_s25] sm:$0xff] %v856_v43  ;;  %s1829_s25 = sshll.u32 %s2019_s16, 4  ;;  %s1830_s25 = int_to_ptr.vmem [resolvable:$false] %s1829_s25 }
 0x183   : > { %p1832_p13 = scmp.lt.s32.totalorder %s1168_s30, %s1830_s25 }
 0x242   : > { %v997_v46 = vpop.f32.mrf.mxu1 }
 0x243   : > { %v998_v47 = vadd.f32 %v1461_v45, %v997_v46 }
 0x244   : > { %v1566_v48 = vpop.f32.mrf.mxu1 }
 0x245   : > { %1003 = vst [vmem:[%s2506_s15] sm:$0xff] %v998_v47  ;;  %v1004_v49 = vpack.c.bf16 %v998_v47, %v998_v47  ;;  %s1831_s15 = scalar_lea.vmem %s1830_s25, 256 }
 0x246   : > { %v1000_v50 = vpop.f32.mrf.mxu1  ;;  %p1833_p0 = scmp.lt.s32.totalorder %s1831_s15, %s1825_s23 }
 0x247   : > { %1585 = vmatmul.mubr.bf16.vlgmr.msra.gmra.mxu0 %v1004_v49 }
 0x248   : > { %v1567_v51 = vpop.f32.mrf.mxu1  ;;  %p1834_p2 = por %p1833_p0, %p1832_p13 }
 0x24a   : > { %p1835_p10 = pnand %p1834_p2, %p1828_p9 }
 0x24c   : > { %1838 = shalt.err (!%p1835_p10)
}
 0x24d   : > { %s1839_s20 = scalar_lea.hbm %s1165_s19, 128  ;;  %s1843_s5 = scalar_lea.hbm %s2491_s10, 256 }
 0x24e   : > { %p1840_p6 = scmp.ne.s32.totalorder %s1165_s19, %s1839_s20  ;;  %p1844_p3 = scmp.lt.s32.totalorder %s1165_s19, %s2491_s10 }
 0x24f   : > { %p1845_p11 = scmp.lt.s32.totalorder %s1843_s5, %s1839_s20 }
 0x250   : > { %p1841_p4 = pnand %p1840_p6, %p2538_p1 }
 0x251   : > { %p1846_p5 = por %p1845_p11, %p1844_p3 }
 0x252   : > { %p1842_p8 = pneg %p1841_p4 }
 0x254   : > { %p1847_p7 = pnand %p1846_p5, %p1842_p8 }
 0x256   : > { %1850 = shalt.err (!%p1847_p7)
}
 0x257   : > { %1603 = dma.vmem_to_hbm [thread:$0]  (%p2538_p1), %s1168_s30, 128, %s1165_s19, %s2348_s27  }
 0x258   : > { %s1191_s23 = scalar_lea.hbm %s2493_s12, %s2338_s14  ;;  %s2539_s16 = scalar_lea.vmem [#allocation14], %s2302_s17 }
 0x259   : > { %s1193_s7 = sshll.u32 %s2539_s16, 4  ;;  %s2540_s0 = sand.u32 1, %s2117_s29   ;;  %s1194_s7 = int_to_ptr.vmem [resolvable:$true] %s1193_s7 }
 0x25a   : > { %s2371_s2 = scalar_lea.sflag [#allocation15], %s2540_s0  ;;  %s1851_s5 = scalar_lea.vmem %s1194_s7, 128 }
 0x25b   : > { %p1852_p12 = scmp.ne.s32.totalorder %s1194_s7, %s1851_s5  ;;  %s2020_s20 = smov [#allocation14]  }
 0x25c   : > { %s1855_s21 = sshll.u32 %s2020_s20, 4  ;;  %s1856_s21 = int_to_ptr.vmem [resolvable:$false] %s1855_s21 }
 0x25d   : > { %p1853_p9 = pnand %p1852_p12, %p2538_p1  ;;  %s1857_s3 = scalar_lea.vmem %s1856_s21, 256 }
 0x25e   : > { %p1858_p0 = scmp.lt.s32.totalorder %s1194_s7, %s1856_s21  ;;  %p1859_p2 = scmp.lt.s32.totalorder %s1857_s3, %s1851_s5 }
 0x25f   : > { %p1854_p13 = pneg %p1853_p9 }
 0x260   : > { %p1860_p10 = por %p1859_p2, %p1858_p0 }
 0x262   : > { %p1861_p6 = pnand %p1860_p10, %p1854_p13 }
 0x264   : > { %1864 = shalt.err (!%p1861_p6)
}
 0x265   : > { %s1865_s19 = scalar_lea.hbm %s1191_s23, 128  ;;  %s1869_s15 = scalar_lea.hbm %s2493_s12, 256 }
 0x266   : > { %p1866_p4 = scmp.ne.s32.totalorder %s1191_s23, %s1865_s19  ;;  %p1870_p11 = scmp.lt.s32.totalorder %s1191_s23, %s2493_s12 }
 0x267   : > { %p1871_p5 = scmp.lt.s32.totalorder %s1869_s15, %s1865_s19 }
 0x268   : > { %p1867_p8 = pnand %p1866_p4, %p2538_p1 }
 0x269   : > { %p1872_p7 = por %p1871_p5, %p1870_p11 }
 0x26a   : > { %p1868_p3 = pneg %p1867_p8 }
 0x26c   : > { %p1873_p12 = pnand %p1872_p7, %p1868_p3 }
 0x26e   : > { %1876 = shalt.err (!%p1873_p12)
}
 0x26f   : > { %1605 = dma.vmem_to_hbm [thread:$0]  (%p2538_p1), %s1194_s7, 128, %s1191_s23, %s2371_s2  }
 0x270   : > { %s1493_s3 = sshll.u32 %s2117_s29, 10  ;;  %s1118_s19 = scalar_lea.sflag [#allocation4], %s2245_s22 }
 0x271   : > { %s2390_s21 = scalar_lea.hbm %s2490_s9, %s1493_s3  ;;  %s1877_s30 = scalar_lea.vmem %s2334_s1, 1024 }
 0x272   : > { %p1878_p9 = scmp.ne.s32.totalorder %s2334_s1, %s1877_s30  ;;  %s2021_s25 = smov [#allocation10]  }
 0x273   : > { %s1881_s15 = sshll.u32 %s2021_s25, 4  ;;  %s1882_s15 = int_to_ptr.vmem [resolvable:$false] %s1881_s15 }
 0x274   : > { %p1879_p13 = pnand %p1878_p9, %p2538_p1  ;;  %s1883_s16 = scalar_lea.vmem %s1882_s15, 2048 }
 0x275   : > { %p1884_p2 = scmp.lt.s32.totalorder %s2334_s1, %s1882_s15  ;;  %p1885_p10 = scmp.lt.s32.totalorder %s1883_s16, %s1877_s30 }
 0x276   : > { %p1880_p0 = pneg %p1879_p13 }
 0x277   : > { %p1886_p6 = por %p1885_p10, %p1884_p2 }
 0x279   : > { %p1887_p4 = pnand %p1886_p6, %p1880_p0 }
 0x27b   : > { %1890 = shalt.err (!%p1887_p4)
}
 0x27c   : > { %s1891_s29 = scalar_lea.hbm %s2390_s21, 1024  ;;  %s1895_s0 = scalar_lea.hbm %s2490_s9, 2048 }
 0x27d   : > { %p1892_p8 = scmp.ne.s32.totalorder %s2390_s21, %s1891_s29  ;;  %p1896_p5 = scmp.lt.s32.totalorder %s2390_s21, %s2490_s9 }
 0x27e   : > { %p1897_p7 = scmp.lt.s32.totalorder %s1895_s0, %s1891_s29 }
 0x27f   : > { %p1893_p3 = pnand %p1892_p8, %p2538_p1 }
 0x280   : > { %p1898_p12 = por %p1897_p7, %p1896_p5 }
 0x281   : > { %p1894_p11 = pneg %p1893_p3 }
 0x283   : > { %p1899_p9 = pnand %p1898_p12, %p1894_p11 }
 0x285   : > { %1902 = shalt.err (!%p1899_p9)
}
 0x286   : > { %s2022_s20 = smov 128   ;;  %s2023_s30 = smov 8  }
 0x287   : > { %1602 = dma.vmem_to_hbm [thread:$0]  (%p2538_p1), %s2334_s1, 1024, %s2390_s21, %s1118_s19, %s2022_s20, %s2022_s20, %s2023_s30  }
 0x288   : > { %s1178_s16 = scalar_lea.hbm %s2492_s11, %s2338_s14  ;;  %s2541_s29 = scalar_lea.vmem [#allocation13], %s2302_s17 }
 0x289   : > { %s1180_s23 = sshll.u32 %s2541_s29, 4  ;;  %s2024_s0 = smov [#allocation13]   ;;  %s1181_s23 = int_to_ptr.vmem [resolvable:$true] %s1180_s23 }
 0x28a   : > { %s1903_s7 = scalar_lea.vmem %s1181_s23, 128  ;;  %s1907_s3 = sshll.u32 %s2024_s0, 4  ;;  %s1908_s3 = int_to_ptr.vmem [resolvable:$false] %s1907_s3 }
 0x28b   : > { %p1904_p13 = scmp.ne.s32.totalorder %s1181_s23, %s1903_s7  ;;  %s1909_s5 = scalar_lea.vmem %s1908_s3, 256 }
 0x28c   : > { %p1910_p10 = scmp.lt.s32.totalorder %s1181_s23, %s1908_s3  ;;  %p1911_p6 = scmp.lt.s32.totalorder %s1909_s5, %s1903_s7 }
 0x28d   : > { %p1905_p0 = pnand %p1904_p13, %p2538_p1 }
 0x28e   : > { %p1912_p4 = por %p1911_p6, %p1910_p10 }
 0x28f   : > { %p1906_p2 = pneg %p1905_p0 }
 0x291   : > { %p1913_p8 = pnand %p1912_p4, %p1906_p2 }
 0x293   : > { %1916 = shalt.err (!%p1913_p8)
}
 0x294   : > { %s1917_s22 = scalar_lea.hbm %s1178_s16, 128  ;;  %s1921_s19 = scalar_lea.hbm %s2492_s11, 256 }
 0x295   : > { %p1918_p3 = scmp.ne.s32.totalorder %s1178_s16, %s1917_s22  ;;  %p1922_p7 = scmp.lt.s32.totalorder %s1178_s16, %s2492_s11 }
 0x296   : > { %p1923_p12 = scmp.lt.s32.totalorder %s1921_s19, %s1917_s22 }
 0x297   : > { %p1919_p11 = pnand %p1918_p3, %p2538_p1 }
 0x298   : > { %p1924_p9 = por %p1923_p12, %p1922_p7 }
 0x299   : > { %p1920_p5 = pneg %p1919_p11 }
 0x29b   : > { %p1925_p13 = pnand %p1924_p9, %p1920_p5 }
 0x29d   : > { %1928 = shalt.err (!%p1925_p13)
}
 0x29e   : > { %1604 = dma.vmem_to_hbm [thread:$0]  (%p2538_p1), %s1181_s23, 128, %s1178_s16, %s2348_s27   ;;  %v1470_v52 = vld [vmem:[%s2489_s8] ss:$0 sm:$0xff] }
 0x29f   : > { %s537_s29 = scalar_lea.vmem [#allocation16], %s2302_s17  ;;  %s2442_s5 = scalar_lea.hbm %s2494_s13, %s2338_s14 }
 0x2a0   : > { %s1206_s7 = sshll.u32 %s537_s29, 4  ;;  %s2025_s27 = smov [#allocation16]   ;;  %s1207_s7 = int_to_ptr.vmem [resolvable:$true] %s1206_s7 }
 0x2a1   : > { %s1929_s22 = scalar_lea.vmem %s1207_s7, 128  ;;  %s1933_s16 = sshll.u32 %s2025_s27, 4  ;;  %s1934_s16 = int_to_ptr.vmem [resolvable:$false] %s1933_s16 }
 0x2a2   : > { %p1930_p0 = scmp.ne.s32.totalorder %s1207_s7, %s1929_s22  ;;  %s1935_s17 = scalar_lea.vmem %s1934_s16, 256 }
 0x2a3   : > { %p1936_p6 = scmp.lt.s32.totalorder %s1207_s7, %s1934_s16  ;;  %p1937_p4 = scmp.lt.s32.totalorder %s1935_s17, %s1929_s22 }
 0x2a4   : > { %p1931_p2 = pnand %p1930_p0, %p2538_p1 }
 0x2a5   : > { %p1938_p8 = por %p1937_p4, %p1936_p6 }
 0x2a6   : > { %p1932_p10 = pneg %p1931_p2 }
 0x2a8   : > { %p1939_p3 = pnand %p1938_p8, %p1932_p10 }
 0x307   : > { %v1110_v53 = vpop.f32.mrf.mxu0 }
 0x308   : > { %v1111_v54 = vadd.f32 %v1470_v52, %v1110_v53 }
 0x309   : > { %v1586_v55 = vpop.f32.mrf.mxu0 }
 0x30a   : > { %1116 = vst [vmem:[%s537_s29] sm:$0xff] %v1111_v54 }
 0x30b   : > { %v1113_v56 = vpop.f32.mrf.mxu0 }
 0x30c   : > { %1942 = shalt.err (!%p1939_p3)
}
 0x30d   : > { %s1943_s14 = scalar_lea.hbm %s2442_s5, 128  ;;  %s1947_s21 = scalar_lea.hbm %s2494_s13, 256 }
 0x30e   : > { %p1944_p11 = scmp.ne.s32.totalorder %s2442_s5, %s1943_s14  ;;  %p1948_p12 = scmp.lt.s32.totalorder %s2442_s5, %s2494_s13 }
 0x30f   : > { %p1949_p9 = scmp.lt.s32.totalorder %s1947_s21, %s1943_s14 }
 0x310   : > { %p1945_p5 = pnand %p1944_p11, %p2538_p1 }
 0x311   : > { %p1950_p13 = por %p1949_p9, %p1948_p12 }
 0x312   : > { %p1946_p7 = pneg %p1945_p5 }
 0x314   : > { %p1951_p0 = pnand %p1950_p13, %p1946_p7 }
 0x316   : > { %1954 = shalt.err (!%p1951_p0)
}
 0x317   : > { %1606 = dma.vmem_to_hbm [thread:$0]  (%p2538_p1), %s1207_s7, 128, %s2442_s5, %s2371_s2   ;;  %v1587_v57 = vpop.f32.mrf.mxu0 }
 0x318 PF: > { %s2542_s30 = sld [smem:[#allocation23_spill]]  ;;  %p2545_p10 = scmp.ge.s32.totalorder %s2009_s28, 2 }
 0x319   : > { %s2543_s25 = sld [smem:[#allocation25_spill]] }
 0x31e   : > { %s1218_s15 = sand.u32 1, %s2542_s30  }
 0x31f   : > { %p2544_p2 = scmp.ne.s32.totalorder %s2543_s25, 0  ;;  %s1219_s29 = scalar_lea.sflag [#allocation4], %s1218_s15 }
 0x321   : > { %p1627_p6 = pnand %p2545_p10, %p2544_p2 }
 0x323   : > { %p1628_p4 = pneg %p1627_p6 }
 0x325   : > { %1984 = dma.done.wait (%p1628_p4), %s1219_s29, 1024  }
 0x326   : > { %1986 = vsyncadd (%p1628_p4), %s1219_s29, 4294966272  ;;  %s2546_s0 = sadd.s32 4294967294, %s2009_s28  }
 0x327   : > { %s1227_s3 = sand.u32 1, %s2546_s0  }
 0x328   : > { %s1228_s24 = scalar_lea.sflag [#allocation12], %s1227_s3 }
 0x329   : > { %1988 = dma.done.wait (%p1628_p4), %s1228_s24, 256  }
 0x32a   : > { %1990 = vsyncadd (%p1628_p4), %s1228_s24, 4294967040  ;;  %s1246_s2 = scalar_lea.sflag [#allocation15], %s1227_s3 }
 0x32b   : > { %1992 = dma.done.wait (%p1628_p4), %s1246_s2, 256  }
 0x32c   : > { %1994 = vsyncadd (%p1628_p4), %s1246_s2, 4294967040  ;;  %s2547_s7 = sld [smem:[#allocation24_spill]]  ;;  %p35_p1 = scmp.ge.s32.totalorder %s2187_s18, 4  }
 0x32d   : > { %s2548_s27 = sld [smem:[#allocation26_spill]]  ;;  %s2549_s25 = smov %s2001_s26 }
 0x32e   : > { %s2551_s28 = smov %s2187_s18  ;;  %37 = sbr.rel (!%p35_p1) target bundleno = 18 (0x12), region = 177 }
 0x332   : > { %s2550_s26 = smov %s2547_s7 }
 0x333   :  { %1260 = vsyncpa [#allocation3], 1 }
 0x334   :  { %1262 = vsyncpa [#allocation3 + $0x1], 1 }
 0x335   :  { %1263 = vsyncpa [#allocation6], 1 }
 0x336   :  { %1264 = vsyncpa [#allocation9], 1 }
 0x337   :  { %1265 = vsyncpa [#allocation4], 1 }
 0x338   :  { %1267 = vsyncpa [#allocation4 + $0x1], 1 }
 0x339   :  { %1268 = vsyncpa [#allocation12], 1 }
 0x33a   :  { %1270 = vsyncpa [#allocation12 + $0x1], 1 }
 0x33b   :  { %1271 = vsyncpa [#allocation15], 1 }
 0x33c   :  { %1273 = vsyncpa [#allocation15 + $0x1], 1 }

</bundles_post_ra>
